<compile_context>
chip_gen: v6e
topology: v6e:2x2x1
jax: 0.10.0
libtpu: 0.0.40
codegen_flags: <defaults>
</compile_context>

<pallas_src>
import functools

import jax
import jax.numpy as jnp
from jax.experimental import pallas as pl
from jax.experimental.pallas import tpu as pltpu


# Plain Python float (a jnp scalar would be captured by the kernel trace and
# rejected).  Must stay a large *finite* negative: exp(_NEG - m) underflows to
# exactly 0 so masked logits contribute -0.0 to the l*exp accumulator; -inf
# here would give inf*0 = NaN in the entropy term.
_NEG = -1.0e30


def _round_up(x, m):
    return ((x + m - 1) // m) * m


@functools.lru_cache(maxsize=1)
def _vmem_limit_bytes():
    # ~3/4 of physical VMEM, capped at 100 MiB (v5e/v6e have 128 MiB, v7x has
    # 64 MiB per TensorCore).  Conservative 48 MiB fallback if the query is
    # unavailable (e.g. interpret mode off-TPU).
    try:
        cap = pltpu.get_tpu_info().vmem_capacity_bytes
    except Exception:
        cap = 64 * 1024 * 1024
    return int(min(cap * 3 // 4, 100 * 1024 * 1024))


# ---------------------------------------------------------------------------
# Kernel 1: hidden states (K-tiled emb @ w1 -> tanh) + value head + 1/T scale
# ---------------------------------------------------------------------------
def _hidden_value_kernel(temp_ref,    # SMEM (1,)  1/temperature
                         bv_ref,      # SMEM (1,)  value-head bias
                         emb_ref,     # (Mt, Kt)  bf16 embeddings (K tile)
                         w1_ref,      # (Kt, H)   bf16 base-model dense (K tile)
                         b1_ref,      # (1, H)    f32
                         wv_ref,      # (1, H)    f32 value-head weight row
                         h_out_ref,   # (Mt, H)   bf16  (1/T)-scaled hidden states
                         val_ref,     # (Mt, 1)   f32   value-head output
                         acc_ref):    # (Mt, H)   f32   scratch accumulator
    k = pl.program_id(1)
    nk = pl.num_programs(1)

    @pl.when(k == 0)
    def _init():
        acc_ref[...] = jnp.zeros_like(acc_ref)

    acc_ref[...] += jnp.dot(emb_ref[...], w1_ref[...],
                            preferred_element_type=jnp.float32)

    @pl.when(k == nk - 1)
    def _finalize():
        h = jnp.tanh(acc_ref[...] + b1_ref[...])                     # (Mt, H) f32
        # value head: Linear(H, 1) as a VPU lane reduction on the unscaled h
        val_ref[...] = (jnp.sum(h * wv_ref[...], axis=-1, keepdims=True)
                        + bv_ref[0])
        # temperature pre-scale applied once over (Mt, H); bf16 for the MXU
        h_out_ref[...] = (h * temp_ref[0]).astype(jnp.bfloat16)


# ---------------------------------------------------------------------------
# Kernel 2: vocab-tiled LM head with online softmax, entropy, token gather
# ---------------------------------------------------------------------------
def _lm_head_kernel(v_actual, v_tile, needs_mask,
                    resp_ref,    # (Mt, 1)  int32 response token ids
                    h_ref,       # (Mt, H)  bf16  (1/T)-scaled hidden states
                    wlm_ref,     # (H, Vt)  bf16  LM-head vocab tile
                    col_ref,     # (1, Vt)  int32 local column ids 0..Vt-1
                    out_ref,     # (Mt, 2)  f32   col 0 = logprob, col 1 = entropy
                    m_ref,       # (Mt, 1)  running max
                    s_ref,       # (Mt, 1)  running sum exp(l - m)
                    t_ref,       # (Mt, 1)  running sum l * exp(l - m)
                    tok_ref):    # (Mt, 1)  gathered token logit
    j = pl.program_id(1)
    nv = pl.num_programs(1)

    @pl.when(j == 0)
    def _init():
        m_ref[...] = jnp.full_like(m_ref, _NEG)
        s_ref[...] = jnp.zeros_like(s_ref)
        t_ref[...] = jnp.zeros_like(t_ref)
        tok_ref[...] = jnp.zeros_like(tok_ref)

    logits = jnp.dot(h_ref[...], wlm_ref[...],
                     preferred_element_type=jnp.float32)              # (Mt, Vt) f32
    col = col_ref[...]                                                # (1, Vt)
    base = j * v_tile

    if needs_mask:  # static: only traced when V % v_tile != 0
        logits = jnp.where(col < (v_actual - base), logits, _NEG)

    # token-logit gather via local one-hot (no global (Mt, Vt) iota)
    tgt = resp_ref[...] - base                                        # (Mt, 1)
    tok_ref[...] += jnp.sum(jnp.where(col == tgt, logits, 0.0),
                            axis=-1, keepdims=True)

    # online softmax: single exp pass, fused lse / entropy accumulators
    m_prev = m_ref[...]
    m_new = jnp.maximum(m_prev, jnp.max(logits, axis=-1, keepdims=True))
    alpha = jnp.exp(m_prev - m_new)
    e = jnp.exp(logits - m_new)
    s_ref[...] = alpha * s_ref[...] + jnp.sum(e, axis=-1, keepdims=True)
    t_ref[...] = alpha * t_ref[...] + jnp.sum(logits * e, axis=-1, keepdims=True)
    m_ref[...] = m_new

    @pl.when(j == nv - 1)
    def _finalize():
        s = s_ref[...]
        lse = m_ref[...] + jnp.log(s)                                 # (Mt, 1)
        out_ref[:, 0:1] = tok_ref[...] - lse                          # logprob
        out_ref[:, 1:2] = lse - t_ref[...] / s                        # entropy


# ---------------------------------------------------------------------------
# Wrapper
# ---------------------------------------------------------------------------
def actor_critic_forward(queries, query_attn_masks, responses, params,
                         temperature=1.0):
    """Forward pass of ActorCritic. Returns dict(logprobs, entropies, values)."""
    del query_attn_masks  # unused by the attention-free synthetic base model
    temperature = 1.0 if temperature is None else float(temperature)

    B, _ = queries.shape
    _, Tr = responses.shape
    emb_table = params["emb"]                       # (V, H)
    V, H = emb_table.shape

    # --- tiling --------------------------------------------------------------
    M = B * Tr
    m_tile = max(128, min(256, _round_up(M, 128)))  # 256 at realistic sizes
    m_pad = _round_up(M, m_tile)
    n_rows = m_pad // m_tile                        # keep >= 2 (even) at real
                                                    # sizes for v7x megacore
    v_tile = max(128, min(1024, _round_up(V, 128)))
    v_pad = _round_up(V, v_tile)
    n_vocab = v_pad // v_tile
    needs_mask = (v_pad != V)

    k_tile = H if H <= 512 else 512                 # bounds w1 VMEM footprint
    k_pad = _round_up(H, k_tile)
    n_k = k_pad // k_tile

    # --- operands ------------------------------------------------------------
    # Positions that predict response[t]: last query token, then responses[:-1].
    pred_tokens = jnp.concatenate([queries[:, -1:], responses[:, :-1]], axis=1)
    emb = jnp.take(emb_table, pred_tokens.reshape(-1), axis=0)       # (M, H)
    emb = emb.astype(jnp.bfloat16)                  # no-op: table stored bf16
    resp_flat = responses.reshape(-1).astype(jnp.int32)[:, None]     # (M, 1)
    if m_pad != M:
        emb = jnp.pad(emb, ((0, m_pad - M), (0, 0)))
        resp_flat = jnp.pad(resp_flat, ((0, m_pad - M), (0, 0)))
    if k_pad != H:
        emb = jnp.pad(emb, ((0, 0), (0, k_pad - H)))

    w1 = params["w1"].astype(jnp.bfloat16)                           # (H, H)
    if k_pad != H:
        w1 = jnp.pad(w1, ((0, k_pad - H), (0, 0)))
    b1 = params["b1"].reshape(1, H).astype(jnp.float32)
    w_lm = params["w_lm"].astype(jnp.bfloat16)                       # (H, V)
    if v_pad != V:
        w_lm = jnp.pad(w_lm, ((0, 0), (0, v_pad - V)))
    wv_row = params["w_value"].reshape(1, H).astype(jnp.float32)
    bv = params["b_value"].reshape(-1)[:1].astype(jnp.float32)       # (1,)
    inv_temp = jnp.full((1,), 1.0 / temperature, jnp.float32)        # SMEM scalar
    col_ids = jnp.arange(v_tile, dtype=jnp.int32)[None, :]           # (1, v_tile)

    vmem_limit = _vmem_limit_bytes()
    cparams = pltpu.CompilerParams(
        dimension_semantics=("parallel", "arbitrary"),
        vmem_limit_bytes=vmem_limit)

    # --- kernel 1: hidden states + value head --------------------------------
    h_scaled, values_col = pl.pallas_call(
        _hidden_value_kernel,
        out_shape=(jax.ShapeDtypeStruct((m_pad, H), jnp.bfloat16),
                   jax.ShapeDtypeStruct((m_pad, 1), jnp.float32)),
        grid_spec=pltpu.PrefetchScalarGridSpec(
            num_scalar_prefetch=0,
            grid=(n_rows, n_k),
            in_specs=[
                pl.BlockSpec(memory_space=pltpu.MemorySpace.SMEM),    # 1/temperature
                pl.BlockSpec(memory_space=pltpu.MemorySpace.SMEM),    # value bias
                pl.BlockSpec((m_tile, k_tile), lambda i, k: (i, k)),  # embeddings
                pl.BlockSpec((k_tile, H),      lambda i, k: (k, 0)),  # w1 K-tile
                pl.BlockSpec((1, H),           lambda i, k: (0, 0)),  # b1
                pl.BlockSpec((1, H),           lambda i, k: (0, 0)),  # value weight row
            ],
            out_specs=[
                pl.BlockSpec((m_tile, H), lambda i, k: (i, 0)),       # scaled hidden
                pl.BlockSpec((m_tile, 1), lambda i, k: (i, 0)),       # values
            ],
            scratch_shapes=[pltpu.VMEM((m_tile, H), jnp.float32)]),
        compiler_params=cparams,
    )(inv_temp, bv, emb, w1, b1, wv_row)

    # --- kernel 2: vocab-swept LM head (logprob + entropy) -------------------
    lm_kernel = functools.partial(_lm_head_kernel, V, v_tile, needs_mask)
    logp_ent = pl.pallas_call(
        lm_kernel,
        out_shape=jax.ShapeDtypeStruct((m_pad, 2), jnp.float32),
        grid_spec=pltpu.PrefetchScalarGridSpec(
            num_scalar_prefetch=0,
            grid=(n_rows, n_vocab),
            in_specs=[
                pl.BlockSpec((m_tile, 1),    lambda i, j: (i, 0)),    # response ids
                pl.BlockSpec((m_tile, H),    lambda i, j: (i, 0)),    # scaled hidden
                pl.BlockSpec((H, v_tile),    lambda i, j: (0, j)),    # LM-head tile
                pl.BlockSpec((1, v_tile),    lambda i, j: (0, 0)),    # column ids
            ],
            out_specs=pl.BlockSpec((m_tile, 2), lambda i, j: (i, 0)),
            scratch_shapes=[pltpu.VMEM((m_tile, 1), jnp.float32)] * 4),
        compiler_params=cparams,
    )(resp_flat, h_scaled, w_lm, col_ids)

    logprobs = logp_ent[:M, 0].reshape(B, Tr)
    entropies = logp_ent[:M, 1].reshape(B, Tr)
    values = values_col[:M, 0].reshape(B, Tr)
    return {"logprobs": logprobs, "entropies": entropies, "values": values}


# ---------------------------------------------------------------------------
# Deterministic parameter construction (synthetic, no checkpoint load)
# ---------------------------------------------------------------------------
def make_params(key, vocab_size, hidden_size):
    k_emb, k_w1, k_lm = jax.random.split(key, 3)
    # Matmul weights stored pre-cast to bf16 so the forward pass does not pay
    # an extra HBM read+write cast pass over the largest tensors every call.
    return {
        "emb": (0.1 * jax.random.normal(k_emb, (vocab_size, hidden_size),
                                        jnp.float32)).astype(jnp.bfloat16),
        "w1": (0.1 * jax.random.normal(k_w1, (hidden_size, hidden_size),
                                       jnp.float32)).astype(jnp.bfloat16),
        "b1": jnp.zeros((1, hidden_size), jnp.float32),
        "w_lm": (0.1 * jax.random.normal(k_lm, (hidden_size, vocab_size),
                                         jnp.float32)).astype(jnp.bfloat16),
        # Value.__init__ zero-initializes the value head.
        "w_value": jnp.zeros((hidden_size, 1), jnp.float32),
        "b_value": jnp.zeros((1, 1), jnp.float32),
    }


# ---------------------------------------------------------------------------
# Pure-JAX reference (same bf16 matmul casts, f32 accumulation)
# ---------------------------------------------------------------------------
def _reference(queries, responses, params, temperature):
    pred = jnp.concatenate([queries[:, -1:], responses[:, :-1]], axis=1)
    emb = jnp.take(params["emb"], pred, axis=0).astype(jnp.bfloat16)
    h = jnp.tanh(jnp.dot(emb, params["w1"].astype(jnp.bfloat16),
                         preferred_element_type=jnp.float32) + params["b1"])
    hs = (h * (1.0 / temperature)).astype(jnp.bfloat16)
    logits = jnp.dot(hs, params["w_lm"].astype(jnp.bfloat16),
                     preferred_element_type=jnp.float32)
    logp = jax.nn.log_softmax(logits, axis=-1)
    tok_logp = jnp.take_along_axis(logp, responses[..., None], axis=-1)[..., 0]
    ent = -jnp.sum(jnp.exp(logp) * logp, axis=-1)
    vals = (jnp.einsum("bth,ho->bto", h, params["w_value"])
            + params["b_value"][0, 0])[..., 0]
    return {"logprobs": tok_logp, "entropies": ent, "values": vals}


if __name__ == "__main__":
    B, Tq, Tr, H, V = 2, 8, 8, 32, 128

    key = jax.random.PRNGKey(0)
    k_q, k_r, k_p = jax.random.split(key, 3)

    queries = jax.random.randint(k_q, (B, Tq), 0, V, dtype=jnp.int32)
    query_attn_masks = jnp.ones((B, Tq), jnp.int32)
    responses = jax.random.randint(k_r, (B, Tr), 0, V, dtype=jnp.int32)
    params = make_params(k_p, V, H)

    out = actor_critic_forward(queries, query_attn_masks, responses, params,
                               temperature=0.7)
    jax.block_until_ready(out)

    assert out["logprobs"].shape == (B, Tr)
    assert out["entropies"].shape == (B, Tr)
    assert out["values"].shape == (B, Tr)

    ref = _reference(queries, responses, params, 0.7)
    for name in ("logprobs", "entropies", "values"):
        assert jnp.all(jnp.isfinite(out[name])), name
        assert jnp.allclose(out[name], ref[name], atol=1e-2, rtol=1e-2), name

    print("KERNEL_OK")
</pallas_src>

<mosaic_0001>
module attributes {stable_mosaic.version = 11 : i64} {
  func.func @_hidden_value_kernel(%arg0: i32, %arg1: i32, %arg2: memref<1xf32, #tpu.memory_space<smem>>, %arg3: memref<1xf32, #tpu.memory_space<smem>>, %arg4: memref<128x32xbf16, #tpu.memory_space<vmem>>, %arg5: memref<32x32xbf16, #tpu.memory_space<vmem>>, %arg6: memref<1x32xf32, #tpu.memory_space<vmem>>, %arg7: memref<1x32xf32, #tpu.memory_space<vmem>>, %arg8: memref<128x32xbf16, #tpu.memory_space<vmem>>, %arg9: memref<128x1xf32, #tpu.memory_space<vmem>>, %arg10: memref<128x32xf32, #tpu.memory_space<vmem>>) attributes {dimension_semantics = [#tpu.dimension_semantics<parallel>, #tpu.dimension_semantics<arbitrary>], iteration_bounds = array<i64: 1, 1>, scalar_prefetch = 0 : i64, scratch_operands = 1 : i64, tpu.core_type = #tpu.core_type<tc>, window_params = [{transform_indices = @transform_0, window_bounds = array<i64: 1>}, {transform_indices = @transform_1, window_bounds = array<i64: 1>}, {transform_indices = @transform_2, window_bounds = array<i64: 128, 32>}, {transform_indices = @transform_3, window_bounds = array<i64: 32, 32>}, {pipeline_mode = #tpu.pipeline_mode<synchronous>, transform_indices = @transform_4, window_bounds = array<i64: 1, 32>}, {pipeline_mode = #tpu.pipeline_mode<synchronous>, transform_indices = @transform_5, window_bounds = array<i64: 1, 32>}, {transform_indices = @transform_6, window_bounds = array<i64: 128, 32>}, {transform_indices = @transform_7, window_bounds = array<i64: 128, 1>}]} {
    %c0_i32 = arith.constant 0 : i32
    %0 = arith.cmpi eq, %arg1, %c0_i32 : i32
    %1 = arith.extui %0 : i1 to i32
    %c0_i32_0 = arith.constant 0 : i32
    %2 = arith.cmpi ne, %1, %c0_i32_0 : i32
    scf.if %2 {
      %cst_10 = arith.constant 0.000000e+00 : f32
      %12 = vector.broadcast %cst_10 : f32 to vector<128x32xf32>
      %c0_11 = arith.constant 0 : index
      %c0_12 = arith.constant 0 : index
      %13 = vector.load %arg10[%c0_11, %c0_12] : memref<128x32xf32, #tpu.memory_space<vmem>>, vector<128x32xf32>
      tpu.vector_store %arg10[%c0_11, %c0_12], %12 {strides = array<i32>} : memref<128x32xf32, #tpu.memory_space<vmem>>, vector<128x32xf32>,
    } else {
    }
    %c0 = arith.constant 0 : index
    %c0_1 = arith.constant 0 : index
    %3 = vector.load %arg10[%c0, %c0_1] : memref<128x32xf32, #tpu.memory_space<vmem>>, vector<128x32xf32>
    %c0_2 = arith.constant 0 : index
    %c0_3 = arith.constant 0 : index
    %4 = vector.load %arg4[%c0_2, %c0_3] : memref<128x32xbf16, #tpu.memory_space<vmem>>, vector<128x32xbf16>
    %c0_4 = arith.constant 0 : index
    %c0_5 = arith.constant 0 : index
    %5 = vector.load %arg5[%c0_4, %c0_5] : memref<32x32xbf16, #tpu.memory_space<vmem>>, vector<32x32xbf16>
    %cst = arith.constant dense<0.000000e+00> : vector<128x32xf32>
    %6 = tpu.matmul %4, %5, %cst {dimension_numbers = #tpu.dot_dimension_numbers<[1], [0], [0], [1], [0, 0, 1, 1], [], []>} : vector<128x32xbf16>, vector<32x32xbf16>, vector<128x32xf32> -> vector<128x32xf32>
    %7 = arith.addf %3, %6 : vector<128x32xf32>
    %c0_6 = arith.constant 0 : index
    %c0_7 = arith.constant 0 : index
    %8 = vector.load %arg10[%c0_6, %c0_7] : memref<128x32xf32, #tpu.memory_space<vmem>>, vector<128x32xf32>
    tpu.vector_store %arg10[%c0_6, %c0_7], %7 {strides = array<i32>} : memref<128x32xf32, #tpu.memory_space<vmem>>, vector<128x32xf32>,
    %c0_i32_8 = arith.constant 0 : i32
    %9 = arith.cmpi eq, %arg1, %c0_i32_8 : i32
    %10 = arith.extui %9 : i1 to i32
    %c0_i32_9 = arith.constant 0 : i32
    %11 = arith.cmpi ne, %10, %c0_i32_9 : i32
    scf.if %11 {
      %c0_10 = arith.constant 0 : index
      %c0_11 = arith.constant 0 : index
      %12 = vector.load %arg10[%c0_10, %c0_11] : memref<128x32xf32, #tpu.memory_space<vmem>>, vector<128x32xf32>
      %c0_12 = arith.constant 0 : index
      %c0_13 = arith.constant 0 : index
      %13 = vector.load %arg6[%c0_12, %c0_13] : memref<1x32xf32, #tpu.memory_space<vmem>>, vector<1x32xf32>
      %14 = vector.broadcast %13 : vector<1x32xf32> to vector<128x32xf32>
      %15 = arith.addf %12, %14 : vector<128x32xf32>
      %16 = math.tanh %15 : vector<128x32xf32>
      %c0_14 = arith.constant 0 : index
      %c0_15 = arith.constant 0 : index
      %17 = vector.load %arg7[%c0_14, %c0_15] : memref<1x32xf32, #tpu.memory_space<vmem>>, vector<1x32xf32>
      %18 = vector.broadcast %17 : vector<1x32xf32> to vector<128x32xf32>
      %19 = arith.mulf %16, %18 : vector<128x32xf32>
      %cst_16 = arith.constant dense<0.000000e+00> : vector<128xf32>
      %20 = vector.multi_reduction <add>, %19, %cst_16 [1] : vector<128x32xf32> to vector<128xf32>
      %21 = vector.shape_cast %20 : vector<128xf32> to vector<128x1xf32>
      %c0_17 = arith.constant 0 : index
      %22 = memref.load %arg3[%c0_17] : memref<1xf32, #tpu.memory_space<smem>>
      %23 = vector.broadcast %22 : f32 to vector<128x1xf32>
      %24 = arith.addf %21, %23 : vector<128x1xf32>
      %c0_18 = arith.constant 0 : index
      %c0_19 = arith.constant 0 : index
      %25 = vector.load %arg9[%c0_18, %c0_19] : memref<128x1xf32, #tpu.memory_space<vmem>>, vector<128x1xf32>
      tpu.vector_store %arg9[%c0_18, %c0_19], %24 {strides = array<i32>} : memref<128x1xf32, #tpu.memory_space<vmem>>, vector<128x1xf32>,
      %c0_20 = arith.constant 0 : index
      %26 = memref.load %arg2[%c0_20] : memref<1xf32, #tpu.memory_space<smem>>
      %27 = vector.broadcast %26 : f32 to vector<128x32xf32>
      %28 = arith.mulf %16, %27 : vector<128x32xf32>
      %29 = arith.truncf %28 : vector<128x32xf32> to vector<128x32xbf16>
      %c0_21 = arith.constant 0 : index
      %c0_22 = arith.constant 0 : index
      %30 = vector.load %arg8[%c0_21, %c0_22] : memref<128x32xbf16, #tpu.memory_space<vmem>>, vector<128x32xbf16>
      tpu.vector_store %arg8[%c0_21, %c0_22], %29 {strides = array<i32>} : memref<128x32xbf16, #tpu.memory_space<vmem>>, vector<128x32xbf16>,
    } else {
    }
    return
  }
  func.func @transform_0(%arg0: i32, %arg1: i32) -> i32 {
    %c0_i32 = arith.constant 0 : i32
    %c0_i32_0 = arith.constant 0 : i32
    return %c0_i32 : i32
  }
  func.func @transform_1(%arg0: i32, %arg1: i32) -> i32 {
    %c0_i32 = arith.constant 0 : i32
    %c0_i32_0 = arith.constant 0 : i32
    return %c0_i32 : i32
  }
  func.func @transform_2(%arg0: i32, %arg1: i32) -> (i32, i32) {
    %c0_i32 = arith.constant 0 : i32
    return %arg0, %arg1 : i32, i32
  }
  func.func @transform_3(%arg0: i32, %arg1: i32) -> (i32, i32) {
    %c0_i32 = arith.constant 0 : i32
    %c0_i32_0 = arith.constant 0 : i32
    return %arg1, %c0_i32 : i32, i32
  }
  func.func @transform_4(%arg0: i32, %arg1: i32) -> (i32, i32) {
    %c0_i32 = arith.constant 0 : i32
    %c0_i32_0 = arith.constant 0 : i32
    %c0_i32_1 = arith.constant 0 : i32
    return %c0_i32, %c0_i32_0 : i32, i32
  }
  func.func @transform_5(%arg0: i32, %arg1: i32) -> (i32, i32) {
    %c0_i32 = arith.constant 0 : i32
    %c0_i32_0 = arith.constant 0 : i32
    %c0_i32_1 = arith.constant 0 : i32
    return %c0_i32, %c0_i32_0 : i32, i32
  }
  func.func @transform_6(%arg0: i32, %arg1: i32) -> (i32, i32) {
    %c0_i32 = arith.constant 0 : i32
    %c0_i32_0 = arith.constant 0 : i32
    return %arg0, %c0_i32 : i32, i32
  }
  func.func @transform_7(%arg0: i32, %arg1: i32) -> (i32, i32) {
    %c0_i32 = arith.constant 0 : i32
    %c0_i32_0 = arith.constant 0 : i32
    return %arg0, %c0_i32 : i32, i32
  }
}

</mosaic_0001>

<bundles_post_ra>
// kernel: tpu_custom_call.1
= control target key start
LH: loop header
LB: loop body
LE: loop exit
PB: predicated region body
PF: predicated region fallthrough
CT: control target
= control target key end

     0   :  { %vm32_vm0 = vcmask 261120   ;;  %v691_v1 = vmov 0.0   ;;  %vm537_vm1 = vcmask 257024   ;;  %vm438_vm2 = vcmask 7168   ;;  %s1016_s3 = inlined_call_operand.vmem [shape: bf16[32,32], index: 3, kind: input, shape index: {}]   ;;  %s1017_s2 = inlined_call_operand.vmem [shape: bf16[128,32], index: 2, kind: input, shape index: {}]   ;;  %s1018_s4 = inlined_call_operand.vmem [shape: f32[1,32], index: 4, kind: input, shape index: {}]   ;;  %s1019_s5 = inlined_call_operand.vmem [shape: f32[1,32], index: 5, kind: input, shape index: {}]   ;;  %s1020_s0 = inlined_call_operand.<no memory space> [shape: f32[1], index: 0, kind: input, shape index: {}]   ;;  %s1021_s6 = inlined_call_operand.vmem [shape: bf16[128,32], index: 6, kind: output, shape index: {0}]   ;;  %s1022_s1 = inlined_call_operand.<no memory space> [shape: f32[1], index: 1, kind: input, shape index: {}]   ;;  %s1023_s7 = inlined_call_operand.vmem [shape: f32[128,1], index: 7, kind: output, shape index: {1}]  }
   0x1   :  { %v649_v0 = vld [vmem:[%s1016_s3 + $0x8] sm:$0xff]   ;;  %35 = vst.msk [vmem:[#allocation2 + $0x10] sm:$0xff] %vm32_vm0, %v691_v1  ;;  %33 = vst.msk [vmem:[#allocation2] sm:$0xff] %vm32_vm0, %v691_v1  ;;  %v650_v2 = vld [vmem:[%s1016_s3] sm:$0xff]  }
   0x2   :  { %34 = vst.msk [vmem:[#allocation2 + $0x8] sm:$0xff] %vm32_vm0, %v691_v1  ;;  %36 = vst.msk [vmem:[#allocation2 + $0x18] sm:$0xff] %vm32_vm0, %v691_v1  ;;  %624 = vmatprep.subr.bf16.mxu0 %v649_v0  ;;  %644 = vmatprep.subr.bf16.mxu1 %v649_v0  ;;  %v651_v3 = vld [vmem:[%s1017_s2] sm:$0xff]   ;;  %v653_v5 = vld [vmem:[%s1017_s2 + $0x8] sm:$0xff]  }
   0x3   :  { %37 = vst.msk [vmem:[#allocation2 + $0x20] sm:$0xff] %vm32_vm0, %v691_v1  ;;  %38 = vst.msk [vmem:[#allocation2 + $0x28] sm:$0xff] %vm32_vm0, %v691_v1  ;;  %625 = vmatpush3.bf16.msra.mxu0 %v649_v0  ;;  %646 = vmatpush3.bf16.msra.mxu1 %v649_v0  ;;  %v652_v4 = vld [vmem:[%s1017_s2 + $0x20] sm:$0xff]   ;;  %v654_v6 = vld [vmem:[%s1017_s2 + $0x28] sm:$0xff]  }
   0x4   :  { %39 = vst.msk [vmem:[#allocation2 + $0x30] sm:$0xff] %vm32_vm0, %v691_v1  ;;  %40 = vst.msk [vmem:[#allocation2 + $0x38] sm:$0xff] %vm32_vm0, %v691_v1  ;;  %626 = vmatprep.subr.bf16.mxu0 %v650_v2  ;;  %645 = vmatprep.subr.bf16.mxu1 %v650_v2  ;;  %v655_v7 = vld [vmem:[%s1017_s2 + $0x10] sm:$0xff]   ;;  %v656_v9 = vld [vmem:[%s1017_s2 + $0x18] sm:$0xff]  }
   0x5   :  { %41 = vst.msk [vmem:[#allocation2 + $0x40] sm:$0xff] %vm32_vm0, %v691_v1  ;;  %42 = vst.msk [vmem:[#allocation2 + $0x48] sm:$0xff] %vm32_vm0, %v691_v1  ;;  %628 = vmatprep.mubr.msk.bf16.mxu0 %vm32_vm0, %v651_v3  ;;  %636 = vmatprep.mubr.msk.bf16.mxu1 %vm32_vm0, %v652_v4  ;;  %v657_v8 = vld [vmem:[%s1017_s2 + $0x30] sm:$0xff]   ;;  %v658_v10 = vld [vmem:[%s1017_s2 + $0x38] sm:$0xff]  }
   0x6   :  { %43 = vst.msk [vmem:[#allocation2 + $0x50] sm:$0xff] %vm32_vm0, %v691_v1  ;;  %44 = vst.msk [vmem:[#allocation2 + $0x58] sm:$0xff] %vm32_vm0, %v691_v1  ;;  %v795_v41 = vld [vmem:[%s1018_s4] ss:$0 sm:$0xff] }
   0x7   :  { %45 = vst.msk [vmem:[#allocation2 + $0x60] sm:$0xff] %vm32_vm0, %v691_v1  ;;  %46 = vst.msk [vmem:[#allocation2 + $0x68] sm:$0xff] %vm32_vm0, %v691_v1  ;;  %627 = vmatpush3.bf16.msra.mxu0 %v650_v2  ;;  %647 = vmatpush3.bf16.msra.mxu1 %v650_v2 }
   0x8   :  { %47 = vst.msk [vmem:[#allocation2 + $0x70] sm:$0xff] %vm32_vm0, %v691_v1  ;;  %48 = vst.msk [vmem:[#allocation2 + $0x78] sm:$0xff] %vm32_vm0, %v691_v1  ;;  %v51_v11 = vld [vmem:[#allocation2 + $0x10] sm:$0xff]  ;;  %v49_v15 = vld [vmem:[#allocation2] sm:$0xff] }
   0x9   :  { %v52_v21 = vld [vmem:[#allocation2 + $0x18] sm:$0xff]  ;;  %v50_v27 = vld [vmem:[#allocation2 + $0x8] sm:$0xff] }
   0xa   :  { %629 = vmatmul.mubr.msk.bf16.vlgmr.msra.gmra.mxu0 %vm32_vm0, %v653_v5  ;;  %637 = vmatmul.mubr.msk.bf16.vlgmr.msra.gmra.mxu1 %vm32_vm0, %v654_v6  ;;  %v53_v38 = vld [vmem:[#allocation2 + $0x20] sm:$0xff]  ;;  %v54_v51 = vld [vmem:[#allocation2 + $0x28] sm:$0xff] }
   0xb   :  { %632 = vmatprep.mubr.msk.bf16.mxu0 %vm32_vm0, %v655_v7  ;;  %640 = vmatprep.mubr.msk.bf16.mxu1 %vm32_vm0, %v657_v8  ;;  %v55_v33 = vld [vmem:[#allocation2 + $0x30] sm:$0xff]  ;;  %v56_v43 = vld [vmem:[#allocation2 + $0x38] sm:$0xff] }
   0xc   :  { %v57_v16 = vld [vmem:[#allocation2 + $0x40] sm:$0xff]  ;;  %v58_v28 = vld [vmem:[#allocation2 + $0x48] sm:$0xff] }
   0xd   :  { %v59_v12 = vld [vmem:[#allocation2 + $0x50] sm:$0xff]  ;;  %v60_v22 = vld [vmem:[#allocation2 + $0x58] sm:$0xff] }
   0xe   :  { %v61_v40 = vld [vmem:[#allocation2 + $0x60] sm:$0xff]  ;;  %v62_v57 = vld [vmem:[#allocation2 + $0x68] sm:$0xff] }
   0xf   :  { %v63_v34 = vld [vmem:[#allocation2 + $0x70] sm:$0xff]  ;;  %v64_v47 = vld [vmem:[#allocation2 + $0x78] sm:$0xff] }
  0x12   :  { %633 = vmatmul.mubr.msk.bf16.gmra.mxu0 %vm32_vm0, %v656_v9  ;;  %641 = vmatmul.mubr.msk.bf16.gmra.mxu1 %vm32_vm0, %v658_v10 }
  0xca   :  { %v630_v13 = vpop.f32.mrf.mxu0  ;;  %v638_v14 = vpop.f32.mrf.mxu1 }
  0xcb   :  { %v261_v17 = vadd.f32 %v630_v13, %v51_v11  ;;  %v269_v18 = vadd.f32 %v638_v14, %v59_v12 }
  0xcc   :  { %v196_v19 = vpop.f32.mrf.mxu0  ;;  %v228_v20 = vpop.f32.mrf.mxu1 }
  0xcd   :  { %277 = vst.msk [vmem:[#allocation2 + $0x10] sm:$0xff] %vm32_vm0, %v261_v17  ;;  %285 = vst.msk [vmem:[#allocation2 + $0x50] sm:$0xff] %vm32_vm0, %v269_v18  ;;  %v259_v23 = vadd.f32 %v196_v19, %v49_v15  ;;  %v267_v24 = vadd.f32 %v228_v20, %v57_v16 }
  0xce   :  { %v631_v25 = vpop.f32.mrf.mxu0  ;;  %v639_v26 = vpop.f32.mrf.mxu1 }
  0xcf   :  { %275 = vst.msk [vmem:[#allocation2] sm:$0xff] %vm32_vm0, %v259_v23  ;;  %283 = vst.msk [vmem:[#allocation2 + $0x40] sm:$0xff] %vm32_vm0, %v267_v24  ;;  %v262_v29 = vadd.f32 %v631_v25, %v52_v21  ;;  %v270_v30 = vadd.f32 %v639_v26, %v60_v22  ;;  %v824_v24 = vld [vmem:[%s1019_s5] ss:$0 sm:$0xff]  ;;  %v829_v25 = vstv %s1020_s0 }
  0xd0   :  { %v199_v31 = vpop.f32.mrf.mxu0  ;;  %v231_v32 = vpop.f32.mrf.mxu1 }
  0xd1   :  { %278 = vst.msk [vmem:[#allocation2 + $0x18] sm:$0xff] %vm32_vm0, %v262_v29  ;;  %286 = vst.msk [vmem:[#allocation2 + $0x58] sm:$0xff] %vm32_vm0, %v270_v30  ;;  %v260_v35 = vadd.f32 %v199_v31, %v50_v27  ;;  %v268_v36 = vadd.f32 %v231_v32, %v58_v28 }
  0xd2   :  { %v634_v37 = vpop.f32.mrf.mxu0  ;;  %v642_v39 = vpop.f32.mrf.mxu1 }
  0xd3   :  { %276 = vst.msk [vmem:[#allocation2 + $0x8] sm:$0xff] %vm32_vm0, %v260_v35  ;;  %284 = vst.msk [vmem:[#allocation2 + $0x48] sm:$0xff] %vm32_vm0, %v268_v36  ;;  %v265_v42 = vadd.f32 %v634_v37, %v55_v33  ;;  %v273_v44 = vadd.f32 %v642_v39, %v63_v34 }
  0xd4   :  { %v212_v45 = vpop.f32.mrf.mxu0  ;;  %v244_v46 = vpop.f32.mrf.mxu1  ;;  %v304_v48 = vld [vmem:[#allocation2 + $0x50] sm:$0xff] }
  0xd5   :  { %v296_v49 = vld [vmem:[#allocation2 + $0x10] sm:$0xff]  ;;  %281 = vst.msk [vmem:[#allocation2 + $0x30] sm:$0xff] %vm32_vm0, %v265_v42  ;;  %v263_v50 = vadd.f32 %v212_v45, %v53_v38  ;;  %289 = vst.msk [vmem:[#allocation2 + $0x70] sm:$0xff] %vm32_vm0, %v273_v44  ;;  %v271_v52 = vadd.f32 %v244_v46, %v61_v40  ;;  %v327_v53 = vadd.f32 %v795_v41, %v304_v48 }
  0xd6   :  { %v319_v54 = vadd.f32 %v795_v41, %v296_v49  ;;  %v635_v55 = vpop.f32.mrf.mxu0  ;;  %v643_v56 = vpop.f32.mrf.mxu1  ;;  %v294_v58 = vld [vmem:[#allocation2] sm:$0xff] }
  0xd7   :  { %v302_v59 = vld [vmem:[#allocation2 + $0x40] sm:$0xff]  ;;  %279 = vst.msk [vmem:[#allocation2 + $0x20] sm:$0xff] %vm32_vm0, %v263_v50  ;;  %v266_v60 = vadd.f32 %v635_v55, %v56_v43  ;;  %287 = vst.msk [vmem:[#allocation2 + $0x60] sm:$0xff] %vm32_vm0, %v271_v52  ;;  %v274_v61 = vadd.f32 %v643_v56, %v64_v47  ;;  %659 = vtanh.f32 %v327_v53  ;;  %v317_v62 = vadd.f32 %v795_v41, %v294_v58 }
  0xd8   :  { %v215_v63 = vpop.f32.mrf.mxu0  ;;  %v247_v0 = vpop.f32.mrf.mxu1  ;;  %661 = vtanh.f32 %v319_v54  ;;  %v297_v1 = vld [vmem:[#allocation2 + $0x18] sm:$0xff]  ;;  %v325_v2 = vadd.f32 %v795_v41, %v302_v59 }
  0xd9   :  { %v305_v3 = vld [vmem:[#allocation2 + $0x58] sm:$0xff]  ;;  %282 = vst.msk [vmem:[#allocation2 + $0x38] sm:$0xff] %vm32_vm0, %v266_v60  ;;  %v264_v4 = vadd.f32 %v215_v63, %v54_v51  ;;  %290 = vst.msk [vmem:[#allocation2 + $0x78] sm:$0xff] %vm32_vm0, %v274_v61  ;;  %v272_v5 = vadd.f32 %v247_v0, %v62_v57  ;;  %663 = vtanh.f32 %v317_v62  ;;  %v320_v6 = vadd.f32 %v795_v41, %v297_v1 }
  0xda   :  { %665 = vtanh.f32 %v325_v2  ;;  %v328_v7 = vadd.f32 %v795_v41, %v305_v3  ;;  %v303_v8 = vld [vmem:[#allocation2 + $0x48] sm:$0xff] }
  0xdb   :  { %v295_v9 = vld [vmem:[#allocation2 + $0x8] sm:$0xff]  ;;  %280 = vst.msk [vmem:[#allocation2 + $0x28] sm:$0xff] %vm32_vm0, %v264_v4  ;;  %288 = vst.msk [vmem:[#allocation2 + $0x68] sm:$0xff] %vm32_vm0, %v272_v5  ;;  %667 = vtanh.f32 %v320_v6  ;;  %v326_v10 = vadd.f32 %v795_v41, %v303_v8 }
  0xdc   :  { %v318_v11 = vadd.f32 %v795_v41, %v295_v9  ;;  %669 = vtanh.f32 %v328_v7  ;;  %v300_v12 = vld [vmem:[#allocation2 + $0x30] sm:$0xff] }
  0xdd   :  { %v308_v13 = vld [vmem:[#allocation2 + $0x70] sm:$0xff]  ;;  %671 = vtanh.f32 %v326_v10  ;;  %v323_v14 = vadd.f32 %v795_v41, %v300_v12 }
  0xde   :  { %v331_v15 = vadd.f32 %v795_v41, %v308_v13  ;;  %673 = vtanh.f32 %v318_v11  ;;  %v298_v16 = vld [vmem:[#allocation2 + $0x20] sm:$0xff] }
  0xdf   :  { %v306_v17 = vld [vmem:[#allocation2 + $0x60] sm:$0xff]  ;;  %675 = vtanh.f32 %v323_v14  ;;  %v321_v18 = vadd.f32 %v795_v41, %v298_v16 }
  0xe0   :  { %v329_v19 = vadd.f32 %v795_v41, %v306_v17  ;;  %v301_v20 = vld [vmem:[#allocation2 + $0x38] sm:$0xff]  ;;  %677 = vtanh.f32 %v331_v15 }
  0xe1   :  { %v309_v21 = vld [vmem:[#allocation2 + $0x78] sm:$0xff]  ;;  %v324_v22 = vadd.f32 %v795_v41, %v301_v20  ;;  %679 = vtanh.f32 %v321_v18 }
  0xe2   :  { %v332_v23 = vadd.f32 %v795_v41, %v309_v21  ;;  %v299_v26 = vld [vmem:[#allocation2 + $0x28] sm:$0xff]  ;;  %681 = vtanh.f32 %v329_v19 }
  0xe3   :  { %v307_v27 = vld [vmem:[#allocation2 + $0x68] sm:$0xff]  ;;  %683 = vtanh.f32 %v324_v22  ;;  %v322_v28 = vadd.f32 %v795_v41, %v299_v26 }
  0xe4   :  { %v330_v29 = vadd.f32 %v795_v41, %v307_v27  ;;  %v660_v30 = vpop.eup %659  ;;  %685 = vtanh.f32 %v332_v23 }
  0xe5   :  { %v662_v31 = vpop.eup %661  ;;  %v366_v32 = vmul.f32 %v660_v30, %v824_v24  ;;  %v467_v33 = vmul.f32 %v660_v30, %v829_v25  ;;  %687 = vtanh.f32 %v322_v28 }
  0xe6   :  { %v664_v34 = vpop.eup %663  ;;  %v358_v35 = vmul.f32 %v662_v31, %v824_v24  ;;  %v459_v36 = vmul.f32 %v662_v31, %v829_v25  ;;  %689 = vtanh.f32 %v330_v29 }
  0xe7   :  { %v666_v37 = vpop.eup %665  ;;  %v402_v38 = vsel %vm32_vm0, %v366_v32, 0.0  ;;  %v608_v39 = vpack.c.bf16 %v467_v33, %v467_v33  ;;  %v356_v40 = vmul.f32 %v664_v34, %v824_v24  ;;  %v457_v41 = vmul.f32 %v664_v34, %v829_v25 }
  0xe8   :  { %v668_v42 = vpop.eup %667  ;;  %403 = vadd.xlane.f32.xlu0 %v402_v38  ;;  %v378_v43 = vsel %vm32_vm0, %v358_v35, 0.0  ;;  %v600_v44 = vpack.c.bf16 %v459_v36, %v459_v36  ;;  %v465_v45 = vmul.f32 %v666_v37, %v829_v25  ;;  %v364_v51 = vmul.f32 %v666_v37, %v824_v24 }
  0xe9   :  { %v670_v46 = vpop.eup %669  ;;  %548 = vst.msk [vmem:[%s1021_s6 + $0x28] sm:$0xf] %vm537_vm1, %v608_v39  ;;  %379 = vadd.xlane.f32.xlu1 %v378_v43  ;;  %v598_v47 = vpack.c.bf16 %v457_v41, %v457_v41  ;;  %v359_v48 = vmul.f32 %v668_v42, %v824_v24  ;;  %v460_v49 = vmul.f32 %v668_v42, %v829_v25  ;;  %v372_v55 = vsel %vm32_vm0, %v356_v40, 0.0 }
  0xea   :  { %v672_v50 = vpop.eup %671  ;;  %540 = vst.msk [vmem:[%s1021_s6 + $0x8] sm:$0xf] %vm537_vm1, %v600_v44  ;;  %v606_v52 = vpack.c.bf16 %v465_v45, %v465_v45  ;;  %v468_v53 = vmul.f32 %v670_v46, %v829_v25  ;;  %v367_v60 = vmul.f32 %v670_v46, %v824_v24  ;;  %v396_v6 = vsel %vm32_vm0, %v364_v51, 0.0 }
  0xeb   :  { %v674_v54 = vpop.eup %673  ;;  %538 = vst.msk [vmem:[%s1021_s6] sm:$0xf] %vm537_vm1, %v598_v47  ;;  %v381_v56 = vsel %vm32_vm0, %v359_v48, 0.0  ;;  %v601_v57 = vpack.c.bf16 %v460_v49, %v460_v49  ;;  %v466_v58 = vmul.f32 %v672_v50, %v829_v25  ;;  %v365_v12 = vmul.f32 %v672_v50, %v824_v24 }
  0xec   :  { %v676_v59 = vpop.eup %675  ;;  %373 = vadd.xlane.f32.xlu0 %v372_v55  ;;  %546 = vst.msk [vmem:[%s1021_s6 + $0x20] sm:$0xf] %vm537_vm1, %v606_v52  ;;  %v609_v61 = vpack.c.bf16 %v468_v53, %v468_v53  ;;  %v458_v62 = vmul.f32 %v674_v54, %v829_v25  ;;  %v357_v7 = vmul.f32 %v674_v54, %v824_v24  ;;  %v405_v11 = vsel %vm32_vm0, %v367_v60, 0.0 }
  0xed   :  { %v867_v63 = vpop.eup %677  ;;  %382 = vadd.xlane.f32.xlu1 %v381_v56  ;;  %541 = vst.msk [vmem:[%s1021_s6 + $0xc] sm:$0xf] %vm537_vm1, %v601_v57  ;;  %v607_v0 = vpack.c.bf16 %v466_v58, %v466_v58  ;;  %v463_v1 = vmul.f32 %v676_v59, %v829_v25  ;;  %v362_v23 = vmul.f32 %v676_v59, %v824_v24  ;;  %v399_v28 = vsel %vm32_vm0, %v365_v12, 0.0 }
  0xee   :  { %v680_v2 = vpop.eup %679  ;;  %549 = vst.msk [vmem:[%s1021_s6 + $0x2c] sm:$0xf] %vm537_vm1, %v609_v61  ;;  %v599_v3 = vpack.c.bf16 %v458_v62, %v458_v62  ;;  %v471_v4 = vmul.f32 %v867_v63, %v829_v25  ;;  %v375_v22 = vsel %vm32_vm0, %v357_v7, 0.0  ;;  %v370_v42 = vmul.f32 %v867_v63, %v824_v24 }
  0xef   :  { %v682_v5 = vpop.eup %681  ;;  %547 = vst.msk [vmem:[%s1021_s6 + $0x24] sm:$0xf] %vm537_vm1, %v607_v0  ;;  %v604_v8 = vpack.c.bf16 %v463_v1, %v463_v1  ;;  %v461_v9 = vmul.f32 %v680_v2, %v829_v25  ;;  %v390_v34 = vsel %vm32_vm0, %v362_v23, 0.0  ;;  %v360_v35 = vmul.f32 %v680_v2, %v824_v24 }
  0xf0   :  { %v684_v10 = vpop.eup %683  ;;  %397 = vadd.xlane.f32.xlu0 %v396_v6  ;;  %539 = vst.msk [vmem:[%s1021_s6 + $0x4] sm:$0xf] %vm537_vm1, %v599_v3  ;;  %v469_v13 = vmul.f32 %v682_v5, %v829_v25  ;;  %v612_v14 = vpack.c.bf16 %v471_v4, %v471_v4  ;;  %v368_v38 = vmul.f32 %v682_v5, %v824_v24  ;;  %v414_v45 = vsel %vm32_vm0, %v370_v42, 0.0 }
  0xf1   :  { %v686_v15 = vpop.eup %685  ;;  %406 = vadd.xlane.f32.xlu1 %v405_v11  ;;  %544 = vst.msk [vmem:[%s1021_s6 + $0x18] sm:$0xf] %vm537_vm1, %v604_v8  ;;  %v464_v16 = vmul.f32 %v684_v10, %v829_v25  ;;  %v602_v17 = vpack.c.bf16 %v461_v9, %v461_v9  ;;  %v363_v29 = vmul.f32 %v684_v10, %v824_v24  ;;  %v384_v37 = vsel %vm32_vm0, %v360_v35, 0.0 }
  0xf2   :  { %v688_v18 = vpop.eup %687  ;;  %v610_v19 = vpack.c.bf16 %v469_v13, %v469_v13  ;;  %552 = vst.msk [vmem:[%s1021_s6 + $0x38] sm:$0xf] %vm537_vm1, %v612_v14  ;;  %v472_v20 = vmul.f32 %v686_v15, %v829_v25  ;;  %v408_v41 = vsel %vm32_vm0, %v368_v38, 0.0  ;;  %v371_v44 = vmul.f32 %v686_v15, %v824_v24 }
  0xf3   :  { %v690_v21 = vpop.eup %689  ;;  %v605_v26 = vpack.c.bf16 %v464_v16, %v464_v16  ;;  %542 = vst.msk [vmem:[%s1021_s6 + $0x10] sm:$0xf] %vm537_vm1, %v602_v17  ;;  %v462_v27 = vmul.f32 %v688_v18, %v829_v25  ;;  %v361_v36 = vmul.f32 %v688_v18, %v824_v24  ;;  %v421_v47 = vstv %s1022_s1 }
  0xf4   :  { %376 = vadd.xlane.f32.xlu0 %v375_v22  ;;  %550 = vst.msk [vmem:[%s1021_s6 + $0x30] sm:$0xf] %vm537_vm1, %v610_v19  ;;  %v470_v30 = vmul.f32 %v690_v21, %v829_v25  ;;  %v613_v31 = vpack.c.bf16 %v472_v20, %v472_v20  ;;  %v393_v25 = vsel %vm32_vm0, %v363_v29, 0.0  ;;  %v369_v40 = vmul.f32 %v690_v21, %v824_v24 }
  0xf5   :  { %400 = vadd.xlane.f32.xlu1 %v399_v28  ;;  %545 = vst.msk [vmem:[%s1021_s6 + $0x1c] sm:$0xf] %vm537_vm1, %v605_v26  ;;  %v603_v32 = vpack.c.bf16 %v462_v27, %v462_v27  ;;  %v387_v39 = vsel %vm32_vm0, %v361_v36, 0.0  ;;  %v417_v46 = vsel %vm32_vm0, %v371_v44, 0.0 }
  0xf6   :  { %v611_v33 = vpack.c.bf16 %v470_v30, %v470_v30  ;;  %553 = vst.msk [vmem:[%s1021_s6 + $0x3c] sm:$0xf] %vm537_vm1, %v613_v31  ;;  %v411_v43 = vsel %vm32_vm0, %v369_v40, 0.0 }
  0xf7   :  { %543 = vst.msk [vmem:[%s1021_s6 + $0x14] sm:$0xf] %vm537_vm1, %v603_v32 }
  0xf8   :  { %391 = vadd.xlane.f32.xlu0 %v390_v34  ;;  %551 = vst.msk [vmem:[%s1021_s6 + $0x34] sm:$0xf] %vm537_vm1, %v611_v33 }
  0xf9   :  { %394 = vadd.xlane.f32.xlu1 %v393_v25 }
  0xfc   :  { %385 = vadd.xlane.f32.xlu0 %v384_v37 }
  0xfd   :  { %388 = vadd.xlane.f32.xlu1 %v387_v39 }
 0x100   :  { %409 = vadd.xlane.f32.xlu0 %v408_v41 }
 0x101   :  { %412 = vadd.xlane.f32.xlu1 %v411_v43 }
 0x104   :  { %415 = vadd.xlane.f32.xlu0 %v414_v45 }
 0x105   :  { %418 = vadd.xlane.f32.xlu1 %v417_v46 }
 0x171   :  { %v404_v48 = vpop.xlane.xlu0 %403 }
 0x172   :  { %v432_v49 = vadd.f32 %v421_v47, %v404_v48  ;;  %v380_v50 = vpop.xlane.xlu1 %379 }
 0x173   :  { %v424_v51 = vadd.f32 %v421_v47, %v380_v50 }
 0x174   :  { %449 = vst.msk [vmem:[%s1023_s7 + $0x50] sm:$0xff] %vm438_vm2, %v432_v49 }
 0x175   :  { %441 = vst.msk [vmem:[%s1023_s7 + $0x10] sm:$0xff] %vm438_vm2, %v424_v51  ;;  %v374_v24 = vpop.xlane.xlu0 %373 }
 0x176   :  { %v422_v52 = vadd.f32 %v421_v47, %v374_v24  ;;  %v383_v53 = vpop.xlane.xlu1 %382 }
 0x177   :  { %v425_v54 = vadd.f32 %v421_v47, %v383_v53 }
 0x178   :  { %439 = vst.msk [vmem:[%s1023_s7] sm:$0xff] %vm438_vm2, %v422_v52 }
 0x179   :  { %442 = vst.msk [vmem:[%s1023_s7 + $0x18] sm:$0xff] %vm438_vm2, %v425_v54  ;;  %v398_v55 = vpop.xlane.xlu0 %397 }
 0x17a   :  { %v430_v56 = vadd.f32 %v421_v47, %v398_v55  ;;  %v407_v57 = vpop.xlane.xlu1 %406 }
 0x17b   :  { %v433_v58 = vadd.f32 %v421_v47, %v407_v57 }
 0x17c   :  { %447 = vst.msk [vmem:[%s1023_s7 + $0x40] sm:$0xff] %vm438_vm2, %v430_v56 }
 0x17d   :  { %450 = vst.msk [vmem:[%s1023_s7 + $0x58] sm:$0xff] %vm438_vm2, %v433_v58  ;;  %v377_v59 = vpop.xlane.xlu0 %376 }
 0x17e   :  { %v401_v60 = vpop.xlane.xlu1 %400  ;;  %v423_v61 = vadd.f32 %v421_v47, %v377_v59 }
 0x17f   :  { %v431_v62 = vadd.f32 %v421_v47, %v401_v60 }
 0x180   :  { %440 = vst.msk [vmem:[%s1023_s7 + $0x8] sm:$0xff] %vm438_vm2, %v423_v61 }
 0x181   :  { %448 = vst.msk [vmem:[%s1023_s7 + $0x48] sm:$0xff] %vm438_vm2, %v431_v62  ;;  %v392_v63 = vpop.xlane.xlu0 %391 }
 0x182   :  { %v428_v0 = vadd.f32 %v421_v47, %v392_v63  ;;  %v395_v1 = vpop.xlane.xlu1 %394 }
 0x183   :  { %v429_v2 = vadd.f32 %v421_v47, %v395_v1 }
 0x184   :  { %445 = vst.msk [vmem:[%s1023_s7 + $0x30] sm:$0xff] %vm438_vm2, %v428_v0 }
 0x185   :  { %446 = vst.msk [vmem:[%s1023_s7 + $0x38] sm:$0xff] %vm438_vm2, %v429_v2  ;;  %v386_v3 = vpop.xlane.xlu0 %385 }
 0x186   :  { %v426_v4 = vadd.f32 %v421_v47, %v386_v3  ;;  %v389_v5 = vpop.xlane.xlu1 %388 }
 0x187   :  { %v427_v6 = vadd.f32 %v421_v47, %v389_v5 }
 0x188   :  { %443 = vst.msk [vmem:[%s1023_s7 + $0x20] sm:$0xff] %vm438_vm2, %v426_v4 }
 0x189   :  { %444 = vst.msk [vmem:[%s1023_s7 + $0x28] sm:$0xff] %vm438_vm2, %v427_v6  ;;  %v410_v7 = vpop.xlane.xlu0 %409 }
 0x18a   :  { %v434_v8 = vadd.f32 %v421_v47, %v410_v7  ;;  %v413_v9 = vpop.xlane.xlu1 %412 }
 0x18b   :  { %v435_v10 = vadd.f32 %v421_v47, %v413_v9 }
 0x18c   :  { %451 = vst.msk [vmem:[%s1023_s7 + $0x60] sm:$0xff] %vm438_vm2, %v434_v8 }
 0x18d   :  { %452 = vst.msk [vmem:[%s1023_s7 + $0x68] sm:$0xff] %vm438_vm2, %v435_v10  ;;  %v416_v11 = vpop.xlane.xlu0 %415 }
 0x18e   :  { %v436_v12 = vadd.f32 %v421_v47, %v416_v11  ;;  %v419_v13 = vpop.xlane.xlu1 %418 }
 0x18f   :  { %v437_v14 = vadd.f32 %v421_v47, %v419_v13 }
 0x190   :  { %453 = vst.msk [vmem:[%s1023_s7 + $0x70] sm:$0xff] %vm438_vm2, %v436_v12 }
 0x191   :  { %454 = vst.msk [vmem:[%s1023_s7 + $0x78] sm:$0xff] %vm438_vm2, %v437_v14 }

</bundles_post_ra>
